<compile_context>
chip_gen: v7x
topology: tpu7x:2x2x1
jax: 0.10.0
libtpu: 0.0.40
codegen_flags: <defaults>
</compile_context>

<pallas_src>
import functools

import jax
import jax.numpy as jnp
from jax.experimental import pallas as pl
from jax.experimental.pallas import tpu as pltpu


def mlp_kernel(w0_ref, w1_ref, x_ref, o_ref):
    # w0_ref: (5, 3) f32, SMEM (scalar weights, resident across grid steps)
    # w1_ref: (2, 5) f32, SMEM
    # x_ref:  (3, TILE_B) f32, VMEM  (feature-major: batch on the lane axis)
    # o_ref:  (2, TILE_B) f32, VMEM
    n_hidden, d_in = w0_ref.shape
    d_out, _ = w1_ref.shape

    x = x_ref[...]  # (d_in, TILE_B)

    # Hidden layer: h[j] = tanh(sum_k W0[j, k] * x[k, :])  -- unrolled VPU FMAs.
    h = []
    for j in range(n_hidden):
        acc = w0_ref[j, 0] * x[0:1, :]
        for k in range(1, d_in):
            acc = acc + w0_ref[j, k] * x[k:k + 1, :]
        h.append(jnp.tanh(acc))          # (1, TILE_B), lane-dense

    # Output layer: y[j] = tanh(sum_k W1[j, k] * h[k]).
    ys = []
    for j in range(d_out):
        acc = w1_ref[j, 0] * h[0]
        for k in range(1, n_hidden):
            acc = acc + w1_ref[j, k] * h[k]
        ys.append(jnp.tanh(acc))         # (1, TILE_B)

    o_ref[...] = jnp.concatenate(ys, axis=0)  # (d_out, TILE_B) lane-dense store


@functools.partial(jax.jit, static_argnames=("tile_b",))
def mlp2layer_nobias(x, w0, w1, *, tile_b=512):
    """x: (B, 3) f32, w0: (5, 3) f32, w1: (2, 5) f32 -> (B, 2) f32."""
    B, d_in = x.shape
    n_hidden, _ = w0.shape
    d_out, _ = w1.shape

    # Lane-dense layout: batch on the 128-lane axis, padded to the tile size.
    b_pad = pl.cdiv(B, 128) * 128
    tb = min(tile_b, b_pad)              # tile is a multiple of 128
    b_pad = pl.cdiv(b_pad, tb) * tb
    x_t = jnp.zeros((d_in, b_pad), jnp.float32).at[:, :B].set(x.T)

    out_t = pl.pallas_call(
        mlp_kernel,
        out_shape=jax.ShapeDtypeStruct((d_out, b_pad), jnp.float32),
        grid=(b_pad // tb,),
        in_specs=[
            # Tiny weights: whole-array resident in SMEM for scalar reads.
            pl.BlockSpec(memory_space=pltpu.MemorySpace.SMEM),
            pl.BlockSpec(memory_space=pltpu.MemorySpace.SMEM),
            # Batch-tiled, feature-major input: double-buffered by the pipeline.
            pl.BlockSpec((d_in, tb), lambda i: (0, i)),
        ],
        out_specs=pl.BlockSpec((d_out, tb), lambda i: (0, i)),
        compiler_params=pltpu.CompilerParams(
            dimension_semantics=("parallel",),  # megacore-shardable batch axis
        ),
    )(w0, w1, x_t)

    return out_t[:, :B].T


if __name__ == "__main__":
    key = jax.random.PRNGKey(0)
    k_x, k_w0, k_w1, k_x2 = jax.random.split(key, 4)

    D_IN, N_HIDDEN, D_OUT = 3, 5, 2

    # torch nn.Linear stores weights as (out_features, in_features).
    w0 = jax.random.uniform(k_w0, (N_HIDDEN, D_IN), dtype=jnp.float32,
                            minval=-0.5, maxval=0.5)
    w1 = jax.random.uniform(k_w1, (D_OUT, N_HIDDEN), dtype=jnp.float32,
                            minval=-0.5, maxval=0.5)

    # Small-batch check (single grid step, batch padded to one lane tile).
    B = 8
    x = jax.random.normal(k_x, (B, D_IN), dtype=jnp.float32)
    out = mlp2layer_nobias(x, w0, w1)
    jax.block_until_ready(out)
    ref = jnp.tanh(jnp.tanh(x @ w0.T) @ w1.T)
    assert out.shape == (B, D_OUT)
    assert jnp.allclose(out, ref, atol=1e-5), "mismatch vs reference (B=8)"

    # Ragged batch exercising multiple grid steps + padding slice-off.
    B2 = 200
    x2 = jax.random.normal(k_x2, (B2, D_IN), dtype=jnp.float32)
    out2 = mlp2layer_nobias(x2, w0, w1, tile_b=128)
    jax.block_until_ready(out2)
    ref2 = jnp.tanh(jnp.tanh(x2 @ w0.T) @ w1.T)
    assert out2.shape == (B2, D_OUT)
    assert jnp.allclose(out2, ref2, atol=1e-5), "mismatch vs reference (B=200)"

    print("KERNEL_OK")
</pallas_src>

<mosaic_0001>
module attributes {stable_mosaic.version = 11 : i64} {
  func.func @mlp_kernel(%arg0: i32, %arg1: memref<5x3xf32, #tpu.memory_space<smem>>, %arg2: memref<2x5xf32, #tpu.memory_space<smem>>, %arg3: memref<3x128xf32, #tpu.memory_space<vmem>>, %arg4: memref<2x128xf32, #tpu.memory_space<vmem>>) attributes {dimension_semantics = [#tpu.dimension_semantics<parallel>], iteration_bounds = array<i64: 1>, scalar_prefetch = 0 : i64, scratch_operands = 0 : i64, tpu.core_type = #tpu.core_type<tc>, window_params = [{transform_indices = @transform_0, window_bounds = array<i64: 5, 3>}, {transform_indices = @transform_1, window_bounds = array<i64: 2, 5>}, {transform_indices = @transform_2, window_bounds = array<i64: 3, 128>}, {transform_indices = @transform_3, window_bounds = array<i64: 2, 128>}]} {
    %c0 = arith.constant 0 : index
    %c0_0 = arith.constant 0 : index
    %0 = vector.load %arg3[%c0, %c0_0] : memref<3x128xf32, #tpu.memory_space<vmem>>, vector<3x128xf32>
    %c0_1 = arith.constant 0 : index
    %c0_2 = arith.constant 0 : index
    %1 = memref.load %arg1[%c0_1, %c0_2] : memref<5x3xf32, #tpu.memory_space<smem>>
    %2 = vector.extract_strided_slice %0 {offsets = [0, 0], sizes = [1, 128], strides = [1, 1]} : vector<3x128xf32> to vector<1x128xf32>
    %3 = vector.broadcast %1 : f32 to vector<1x128xf32>
    %4 = arith.mulf %3, %2 : vector<1x128xf32>
    %c0_3 = arith.constant 0 : index
    %c1 = arith.constant 1 : index
    %5 = memref.load %arg1[%c0_3, %c1] : memref<5x3xf32, #tpu.memory_space<smem>>
    %6 = vector.extract_strided_slice %0 {offsets = [1, 0], sizes = [1, 128], strides = [1, 1]} : vector<3x128xf32> to vector<1x128xf32>
    %7 = vector.broadcast %5 : f32 to vector<1x128xf32>
    %8 = arith.mulf %7, %6 : vector<1x128xf32>
    %9 = arith.addf %4, %8 : vector<1x128xf32>
    %c0_4 = arith.constant 0 : index
    %c2 = arith.constant 2 : index
    %10 = memref.load %arg1[%c0_4, %c2] : memref<5x3xf32, #tpu.memory_space<smem>>
    %11 = vector.extract_strided_slice %0 {offsets = [2, 0], sizes = [1, 128], strides = [1, 1]} : vector<3x128xf32> to vector<1x128xf32>
    %12 = vector.broadcast %10 : f32 to vector<1x128xf32>
    %13 = arith.mulf %12, %11 : vector<1x128xf32>
    %14 = arith.addf %9, %13 : vector<1x128xf32>
    %15 = math.tanh %14 : vector<1x128xf32>
    %c1_5 = arith.constant 1 : index
    %c0_6 = arith.constant 0 : index
    %16 = memref.load %arg1[%c1_5, %c0_6] : memref<5x3xf32, #tpu.memory_space<smem>>
    %17 = vector.extract_strided_slice %0 {offsets = [0, 0], sizes = [1, 128], strides = [1, 1]} : vector<3x128xf32> to vector<1x128xf32>
    %18 = vector.broadcast %16 : f32 to vector<1x128xf32>
    %19 = arith.mulf %18, %17 : vector<1x128xf32>
    %c1_7 = arith.constant 1 : index
    %c1_8 = arith.constant 1 : index
    %20 = memref.load %arg1[%c1_7, %c1_8] : memref<5x3xf32, #tpu.memory_space<smem>>
    %21 = vector.extract_strided_slice %0 {offsets = [1, 0], sizes = [1, 128], strides = [1, 1]} : vector<3x128xf32> to vector<1x128xf32>
    %22 = vector.broadcast %20 : f32 to vector<1x128xf32>
    %23 = arith.mulf %22, %21 : vector<1x128xf32>
    %24 = arith.addf %19, %23 : vector<1x128xf32>
    %c1_9 = arith.constant 1 : index
    %c2_10 = arith.constant 2 : index
    %25 = memref.load %arg1[%c1_9, %c2_10] : memref<5x3xf32, #tpu.memory_space<smem>>
    %26 = vector.extract_strided_slice %0 {offsets = [2, 0], sizes = [1, 128], strides = [1, 1]} : vector<3x128xf32> to vector<1x128xf32>
    %27 = vector.broadcast %25 : f32 to vector<1x128xf32>
    %28 = arith.mulf %27, %26 : vector<1x128xf32>
    %29 = arith.addf %24, %28 : vector<1x128xf32>
    %30 = math.tanh %29 : vector<1x128xf32>
    %c2_11 = arith.constant 2 : index
    %c0_12 = arith.constant 0 : index
    %31 = memref.load %arg1[%c2_11, %c0_12] : memref<5x3xf32, #tpu.memory_space<smem>>
    %32 = vector.extract_strided_slice %0 {offsets = [0, 0], sizes = [1, 128], strides = [1, 1]} : vector<3x128xf32> to vector<1x128xf32>
    %33 = vector.broadcast %31 : f32 to vector<1x128xf32>
    %34 = arith.mulf %33, %32 : vector<1x128xf32>
    %c2_13 = arith.constant 2 : index
    %c1_14 = arith.constant 1 : index
    %35 = memref.load %arg1[%c2_13, %c1_14] : memref<5x3xf32, #tpu.memory_space<smem>>
    %36 = vector.extract_strided_slice %0 {offsets = [1, 0], sizes = [1, 128], strides = [1, 1]} : vector<3x128xf32> to vector<1x128xf32>
    %37 = vector.broadcast %35 : f32 to vector<1x128xf32>
    %38 = arith.mulf %37, %36 : vector<1x128xf32>
    %39 = arith.addf %34, %38 : vector<1x128xf32>
    %c2_15 = arith.constant 2 : index
    %c2_16 = arith.constant 2 : index
    %40 = memref.load %arg1[%c2_15, %c2_16] : memref<5x3xf32, #tpu.memory_space<smem>>
    %41 = vector.extract_strided_slice %0 {offsets = [2, 0], sizes = [1, 128], strides = [1, 1]} : vector<3x128xf32> to vector<1x128xf32>
    %42 = vector.broadcast %40 : f32 to vector<1x128xf32>
    %43 = arith.mulf %42, %41 : vector<1x128xf32>
    %44 = arith.addf %39, %43 : vector<1x128xf32>
    %45 = math.tanh %44 : vector<1x128xf32>
    %c3 = arith.constant 3 : index
    %c0_17 = arith.constant 0 : index
    %46 = memref.load %arg1[%c3, %c0_17] : memref<5x3xf32, #tpu.memory_space<smem>>
    %47 = vector.extract_strided_slice %0 {offsets = [0, 0], sizes = [1, 128], strides = [1, 1]} : vector<3x128xf32> to vector<1x128xf32>
    %48 = vector.broadcast %46 : f32 to vector<1x128xf32>
    %49 = arith.mulf %48, %47 : vector<1x128xf32>
    %c3_18 = arith.constant 3 : index
    %c1_19 = arith.constant 1 : index
    %50 = memref.load %arg1[%c3_18, %c1_19] : memref<5x3xf32, #tpu.memory_space<smem>>
    %51 = vector.extract_strided_slice %0 {offsets = [1, 0], sizes = [1, 128], strides = [1, 1]} : vector<3x128xf32> to vector<1x128xf32>
    %52 = vector.broadcast %50 : f32 to vector<1x128xf32>
    %53 = arith.mulf %52, %51 : vector<1x128xf32>
    %54 = arith.addf %49, %53 : vector<1x128xf32>
    %c3_20 = arith.constant 3 : index
    %c2_21 = arith.constant 2 : index
    %55 = memref.load %arg1[%c3_20, %c2_21] : memref<5x3xf32, #tpu.memory_space<smem>>
    %56 = vector.extract_strided_slice %0 {offsets = [2, 0], sizes = [1, 128], strides = [1, 1]} : vector<3x128xf32> to vector<1x128xf32>
    %57 = vector.broadcast %55 : f32 to vector<1x128xf32>
    %58 = arith.mulf %57, %56 : vector<1x128xf32>
    %59 = arith.addf %54, %58 : vector<1x128xf32>
    %60 = math.tanh %59 : vector<1x128xf32>
    %c4 = arith.constant 4 : index
    %c0_22 = arith.constant 0 : index
    %61 = memref.load %arg1[%c4, %c0_22] : memref<5x3xf32, #tpu.memory_space<smem>>
    %62 = vector.extract_strided_slice %0 {offsets = [0, 0], sizes = [1, 128], strides = [1, 1]} : vector<3x128xf32> to vector<1x128xf32>
    %63 = vector.broadcast %61 : f32 to vector<1x128xf32>
    %64 = arith.mulf %63, %62 : vector<1x128xf32>
    %c4_23 = arith.constant 4 : index
    %c1_24 = arith.constant 1 : index
    %65 = memref.load %arg1[%c4_23, %c1_24] : memref<5x3xf32, #tpu.memory_space<smem>>
    %66 = vector.extract_strided_slice %0 {offsets = [1, 0], sizes = [1, 128], strides = [1, 1]} : vector<3x128xf32> to vector<1x128xf32>
    %67 = vector.broadcast %65 : f32 to vector<1x128xf32>
    %68 = arith.mulf %67, %66 : vector<1x128xf32>
    %69 = arith.addf %64, %68 : vector<1x128xf32>
    %c4_25 = arith.constant 4 : index
    %c2_26 = arith.constant 2 : index
    %70 = memref.load %arg1[%c4_25, %c2_26] : memref<5x3xf32, #tpu.memory_space<smem>>
    %71 = vector.extract_strided_slice %0 {offsets = [2, 0], sizes = [1, 128], strides = [1, 1]} : vector<3x128xf32> to vector<1x128xf32>
    %72 = vector.broadcast %70 : f32 to vector<1x128xf32>
    %73 = arith.mulf %72, %71 : vector<1x128xf32>
    %74 = arith.addf %69, %73 : vector<1x128xf32>
    %75 = math.tanh %74 : vector<1x128xf32>
    %c0_27 = arith.constant 0 : index
    %c0_28 = arith.constant 0 : index
    %76 = memref.load %arg2[%c0_27, %c0_28] : memref<2x5xf32, #tpu.memory_space<smem>>
    %77 = vector.broadcast %76 : f32 to vector<1x128xf32>
    %78 = arith.mulf %77, %15 : vector<1x128xf32>
    %c0_29 = arith.constant 0 : index
    %c1_30 = arith.constant 1 : index
    %79 = memref.load %arg2[%c0_29, %c1_30] : memref<2x5xf32, #tpu.memory_space<smem>>
    %80 = vector.broadcast %79 : f32 to vector<1x128xf32>
    %81 = arith.mulf %80, %30 : vector<1x128xf32>
    %82 = arith.addf %78, %81 : vector<1x128xf32>
    %c0_31 = arith.constant 0 : index
    %c2_32 = arith.constant 2 : index
    %83 = memref.load %arg2[%c0_31, %c2_32] : memref<2x5xf32, #tpu.memory_space<smem>>
    %84 = vector.broadcast %83 : f32 to vector<1x128xf32>
    %85 = arith.mulf %84, %45 : vector<1x128xf32>
    %86 = arith.addf %82, %85 : vector<1x128xf32>
    %c0_33 = arith.constant 0 : index
    %c3_34 = arith.constant 3 : index
    %87 = memref.load %arg2[%c0_33, %c3_34] : memref<2x5xf32, #tpu.memory_space<smem>>
    %88 = vector.broadcast %87 : f32 to vector<1x128xf32>
    %89 = arith.mulf %88, %60 : vector<1x128xf32>
    %90 = arith.addf %86, %89 : vector<1x128xf32>
    %c0_35 = arith.constant 0 : index
    %c4_36 = arith.constant 4 : index
    %91 = memref.load %arg2[%c0_35, %c4_36] : memref<2x5xf32, #tpu.memory_space<smem>>
    %92 = vector.broadcast %91 : f32 to vector<1x128xf32>
    %93 = arith.mulf %92, %75 : vector<1x128xf32>
    %94 = arith.addf %90, %93 : vector<1x128xf32>
    %95 = math.tanh %94 : vector<1x128xf32>
    %c1_37 = arith.constant 1 : index
    %c0_38 = arith.constant 0 : index
    %96 = memref.load %arg2[%c1_37, %c0_38] : memref<2x5xf32, #tpu.memory_space<smem>>
    %97 = vector.broadcast %96 : f32 to vector<1x128xf32>
    %98 = arith.mulf %97, %15 : vector<1x128xf32>
    %c1_39 = arith.constant 1 : index
    %c1_40 = arith.constant 1 : index
    %99 = memref.load %arg2[%c1_39, %c1_40] : memref<2x5xf32, #tpu.memory_space<smem>>
    %100 = vector.broadcast %99 : f32 to vector<1x128xf32>
    %101 = arith.mulf %100, %30 : vector<1x128xf32>
    %102 = arith.addf %98, %101 : vector<1x128xf32>
    %c1_41 = arith.constant 1 : index
    %c2_42 = arith.constant 2 : index
    %103 = memref.load %arg2[%c1_41, %c2_42] : memref<2x5xf32, #tpu.memory_space<smem>>
    %104 = vector.broadcast %103 : f32 to vector<1x128xf32>
    %105 = arith.mulf %104, %45 : vector<1x128xf32>
    %106 = arith.addf %102, %105 : vector<1x128xf32>
    %c1_43 = arith.constant 1 : index
    %c3_44 = arith.constant 3 : index
    %107 = memref.load %arg2[%c1_43, %c3_44] : memref<2x5xf32, #tpu.memory_space<smem>>
    %108 = vector.broadcast %107 : f32 to vector<1x128xf32>
    %109 = arith.mulf %108, %60 : vector<1x128xf32>
    %110 = arith.addf %106, %109 : vector<1x128xf32>
    %c1_45 = arith.constant 1 : index
    %c4_46 = arith.constant 4 : index
    %111 = memref.load %arg2[%c1_45, %c4_46] : memref<2x5xf32, #tpu.memory_space<smem>>
    %112 = vector.broadcast %111 : f32 to vector<1x128xf32>
    %113 = arith.mulf %112, %75 : vector<1x128xf32>
    %114 = arith.addf %110, %113 : vector<1x128xf32>
    %115 = math.tanh %114 : vector<1x128xf32>
    %116 = tpu.concatenate %95, %115 in 0 : vector<1x128xf32>, vector<1x128xf32> -> vector<2x128xf32>
    %c0_47 = arith.constant 0 : index
    %c0_48 = arith.constant 0 : index
    %117 = vector.load %arg4[%c0_47, %c0_48] : memref<2x128xf32, #tpu.memory_space<vmem>>, vector<2x128xf32>
    tpu.vector_store %arg4[%c0_47, %c0_48], %116 {strides = array<i32>} : memref<2x128xf32, #tpu.memory_space<vmem>>, vector<2x128xf32>,
    return
  }
  func.func @transform_0(%arg0: i32) -> (i32, i32) {
    %c0_i32 = arith.constant 0 : i32
    %c0_i32_0 = arith.constant 0 : i32
    %c0_i32_1 = arith.constant 0 : i32
    return %c0_i32, %c0_i32_0 : i32, i32
  }
  func.func @transform_1(%arg0: i32) -> (i32, i32) {
    %c0_i32 = arith.constant 0 : i32
    %c0_i32_0 = arith.constant 0 : i32
    %c0_i32_1 = arith.constant 0 : i32
    return %c0_i32, %c0_i32_0 : i32, i32
  }
  func.func @transform_2(%arg0: i32) -> (i32, i32) {
    %c0_i32 = arith.constant 0 : i32
    %c0_i32_0 = arith.constant 0 : i32
    return %c0_i32, %arg0 : i32, i32
  }
  func.func @transform_3(%arg0: i32) -> (i32, i32) {
    %c0_i32 = arith.constant 0 : i32
    %c0_i32_0 = arith.constant 0 : i32
    return %c0_i32, %arg0 : i32, i32
  }
}

</mosaic_0001>

<bundles_post_ra>
// kernel: mlp2layer_nobias.1
= control target key start
LH: loop header
LB: loop body
LE: loop exit
PB: predicated region body
PF: predicated region fallthrough
CT: control target
= control target key end

     0   :  { %8 = vsyncpa [#allocation3], 0  ;;  %s310_s0 = inlined_call_operand.vmem [shape: f32[5,3], index: 0, kind: input, shape index: {}]   ;;  %s311_s1 = inlined_call_operand.vmem [shape: f32[2,5], index: 1, kind: input, shape index: {}]   ;;  %s312_s2 = inlined_call_operand.vmem [shape: f32[3,128], index: 2, kind: input, shape index: {}]   ;;  %s313_s3 = inlined_call_operand.vmem [shape: f32[2,128], index: 3, kind: output, shape index: {}]  }
   0x1   :  { %s16_s14 = sshll.u32 %s310_s0, 4  ;;  %s17_s14 = int_to_ptr.vmem [resolvable:$true] %s16_s14 }
   0x2   :  { %9 = vsyncpa [#allocation5], 0  ;;  %s26_s17 = sshll.u32 %s311_s1, 4  ;;  %s221_s18 = scalar_lea.vmem %s17_s14, 128  ;;  %s27_s17 = int_to_ptr.vmem [resolvable:$true] %s26_s17 }
   0x3   :  { %p222_p0 = scmp.ne.s32.totalorder %s17_s14, %s221_s18  ;;  %p226_p1 = scmp.lt.s32.totalorder %s17_s14, %s17_s14 }
   0x4   :  { %p227_p2 = scmp.lt.s32.totalorder %s221_s18, %s221_s18 }
   0x6   :  { %p228_p3 = por %p227_p2, %p226_p1 }
   0x8   :  { %p229_p4 = pnand %p228_p3, %p222_p0 }
   0xa   :  { %232 = shalt.err (!%p229_p4)
}
   0xb   :  { %s249_s19 = smov [#allocation2]   ;;  %s233_s20 = scalar_lea.vmem %s27_s17, 32 }
   0xc   :  { %19 = dma.vmem_to_smem %s17_s14, 128, %s249_s19, [#allocation3]  }
   0xd   :  { %p234_p5 = scmp.ne.s32.totalorder %s27_s17, %s233_s20  ;;  %p238_p6 = scmp.lt.s32.totalorder %s27_s17, %s27_s17 }
   0xe   :  { %p239_p7 = scmp.lt.s32.totalorder %s233_s20, %s233_s20 }
  0x10   :  { %p240_p8 = por %p239_p7, %p238_p6 }
  0x12   :  { %p241_p9 = pnand %p240_p8, %p234_p5 }
  0x14   :  { %244 = shalt.err (!%p241_p9)
}
  0x15   :  { %s250_s0 = smov [#allocation4]  }
  0x16   :  { %29 = dma.vmem_to_smem %s27_s17, 32, %s250_s0, [#allocation5]  }
  0x17   :  { %245 = dma.done.wait [#allocation3], 128  }
  0x18   :  { %246 = vsyncadd [#allocation3], 4294967168 }
  0x19   :  { %247 = dma.done.wait [#allocation5], 32  }
  0x1a   :  { %248 = vsyncadd [#allocation5], 4294967264 }
  0x1b   :  { %38 = sfence }
  0x1c   :  { %s40_s1 = sld [smem:[#allocation2]]  ;;  %s182_s21 = sld [smem:[#allocation2 + $0x1]]  ;;  %v39_v0 = vld [vmem:[%s312_s2] sm:$0x7]  ;;  %vm173_vm0 = vcmask 1040384  }
  0x1d   :  { %s183_s22 = sld [smem:[#allocation2 + $0x2]]  ;;  %s184_s23 = sld [smem:[#allocation2 + $0x80]] }
  0x1e   :  { %s185_s24 = sld [smem:[#allocation2 + $0x81]]  ;;  %s186_s25 = sld [smem:[#allocation2 + $0x82]] }
  0x1f   :  { %s187_s26 = sld [smem:[#allocation2 + $0x100]]  ;;  %s188_s27 = sld [smem:[#allocation2 + $0x101]] }
  0x20   :  { %s189_s30 = sld [smem:[#allocation2 + $0x102]]  ;;  %s280_s4 = sld [smem:[#allocation2 + $0x180]] }
  0x21   :  { %s282_s5 = sld [smem:[#allocation2 + $0x181]]  ;;  %s284_s6 = sld [smem:[#allocation2 + $0x182]] }
  0x22   :  { %v41_v1 = vstv %s40_s1  ;;  %v44_v2 = vstv %s182_s21  ;;  %s286_s7 = sld [smem:[#allocation2 + $0x200]]  ;;  %s288_s2 = sld [smem:[#allocation2 + $0x201]] }
  0x23   :  { %v42_v3 = vmul.f32 %v41_v1, %v39_v0  ;;  %v45_v4 = vmul.f32 %v44_v2, %v39_v0  ;;  %v51_v5 = vstv %s183_s22  ;;  %v59_v6 = vstv %s184_s23  ;;  %s290_s8 = sld [smem:[#allocation2 + $0x202]]  ;;  %s296_s9 = sld [smem:[#allocation4]] }
  0x24   :  { %v52_v7 = vmul.f32 %v51_v5, %v39_v0  ;;  %v60_v8 = vmul.f32 %v59_v6, %v39_v0  ;;  %v62_v9 = vstv %s185_s24  ;;  %v69_v10 = vstv %s186_s25  ;;  %s298_s10 = sld [smem:[#allocation4 + $0x80]]  ;;  %s196_s11 = sld [smem:[#allocation4 + $0x1]] }
  0x25   :  { %v47_v11 = vrot.slane %v45_v4, 1  ;;  %v63_v12 = vmul.f32 %v62_v9, %v39_v0  ;;  %v70_v13 = vmul.f32 %v69_v10, %v39_v0  ;;  %v77_v14 = vstv %s187_s26  ;;  %s201_s12 = sld [smem:[#allocation4 + $0x81]]  ;;  %s197_s13 = sld [smem:[#allocation4 + $0x2]] }
  0x26   :  { %v54_v15 = vrot.slane %v52_v7, 2  ;;  %v78_v16 = vmul.f32 %v77_v14, %v39_v0  ;;  %v80_v17 = vstv %s188_s27  ;;  %v87_v18 = vstv %s189_s30  ;;  %s202_s14 = sld [smem:[#allocation4 + $0x82]]  ;;  %s198_s15 = sld [smem:[#allocation4 + $0x3]] }
  0x27   :  { %v49_v19 = vadd.f32 %v47_v11, %v42_v3  ;;  %v65_v20 = vrot.slane %v63_v12, 1  ;;  %v72_v21 = vrot.slane %v70_v13, 2  ;;  %v81_v22 = vmul.f32 %v80_v17, %v39_v0  ;;  %s302_s16 = sld [smem:[#allocation4 + $0x83]]  ;;  %s199_s17 = sld [smem:[#allocation4 + $0x4]] }
  0x28   :  { %v88_v23 = vmul.f32 %v87_v18, %v39_v0  ;;  %v95_v24 = vstv %s280_s4  ;;  %v98_v25 = vstv %s282_s5  ;;  %v105_v26 = vstv %s284_s6  ;;  %s204_s18 = sld [smem:[#allocation4 + $0x84]] }
  0x29   :  { %v56_v27 = vadd.f32 %v54_v15, %v49_v19  ;;  %v67_v28 = vadd.f32 %v65_v20, %v60_v8  ;;  %v83_v29 = vrot.slane %v81_v22, 1  ;;  %v96_v30 = vmul.f32 %v95_v24, %v39_v0 }
  0x2a   :  { %v90_v31 = vrot.slane %v88_v23, 2  ;;  %v99_v32 = vmul.f32 %v98_v25, %v39_v0  ;;  %v106_v33 = vmul.f32 %v105_v26, %v39_v0  ;;  %v113_v34 = vstv %s286_s7 }
  0x2b   :  { %207 = vtanh.f32 %v56_v27  ;;  %v74_v35 = vadd.f32 %v72_v21, %v67_v28  ;;  %v85_v36 = vadd.f32 %v83_v29, %v78_v16  ;;  %v114_v37 = vmul.f32 %v113_v34, %v39_v0 }
  0x2c   :  { %v101_v38 = vrot.slane %v99_v32, 1  ;;  %v108_v39 = vrot.slane %v106_v33, 2  ;;  %v116_v40 = vstv %s288_s2  ;;  %v123_v41 = vstv %s290_s8 }
  0x2d   :  { %209 = vtanh.f32 %v74_v35  ;;  %v92_v42 = vadd.f32 %v90_v31, %v85_v36  ;;  %v117_v43 = vmul.f32 %v116_v40, %v39_v0  ;;  %v124_v44 = vmul.f32 %v123_v41, %v39_v0 }
  0x2e   :  { %v103_v45 = vadd.f32 %v101_v38, %v96_v30  ;;  %v131_v51 = vstv %s296_s9  ;;  %v151_v52 = vstv %s298_s10  ;;  %v134_v54 = vstv %s196_s11 }
  0x2f   :  { %211 = vtanh.f32 %v92_v42  ;;  %v119_v46 = vrot.slane %v117_v43, 1  ;;  %v126_v47 = vrot.slane %v124_v44, 2  ;;  %v154_v55 = vstv %s201_s12 }
  0x30   :  { %v110_v48 = vadd.f32 %v108_v39, %v103_v45  ;;  %v138_v59 = vstv %s197_s13  ;;  %v158_v60 = vstv %s202_s14  ;;  %v142_v0 = vstv %s198_s15 }
  0x31   :  { %v121_v49 = vadd.f32 %v119_v46, %v114_v37  ;;  %v162_v1 = vstv %s302_s16  ;;  %v146_v10 = vstv %s199_s17  ;;  %v166_v12 = vstv %s204_s18 }
  0x32   :  { %213 = vtanh.f32 %v110_v48 }
  0x33   :  { %v128_v50 = vadd.f32 %v126_v47, %v121_v49 }
  0x35   :  { %v208_v53 = vpop.eup %207  ;;  %215 = vtanh.f32 %v128_v50 }
  0x36   :  { %v132_v56 = vmul.f32 %v208_v53, %v131_v51  ;;  %v152_v57 = vmul.f32 %v208_v53, %v151_v52 }
  0x37   :  { %v210_v58 = vpop.eup %209 }
  0x38   :  { %v135_v61 = vmul.f32 %v210_v58, %v134_v54  ;;  %v155_v62 = vmul.f32 %v210_v58, %v154_v55 }
  0x39   :  { %v212_v63 = vpop.eup %211 }
  0x3a   :  { %v136_v2 = vadd.f32 %v135_v61, %v132_v56  ;;  %v139_v3 = vmul.f32 %v212_v63, %v138_v59  ;;  %v156_v4 = vadd.f32 %v155_v62, %v152_v57  ;;  %v159_v5 = vmul.f32 %v212_v63, %v158_v60 }
  0x3c   :  { %v214_v6 = vpop.eup %213  ;;  %v140_v7 = vadd.f32 %v139_v3, %v136_v2  ;;  %v160_v8 = vadd.f32 %v159_v5, %v156_v4 }
  0x3d   :  { %v143_v9 = vmul.f32 %v214_v6, %v142_v0  ;;  %v163_v11 = vmul.f32 %v214_v6, %v162_v1 }
  0x3f   :  { %v216_v13 = vpop.eup %215  ;;  %v144_v14 = vadd.f32 %v143_v9, %v140_v7  ;;  %v164_v15 = vadd.f32 %v163_v11, %v160_v8 }
  0x40   :  { %v147_v16 = vmul.f32 %v216_v13, %v146_v10  ;;  %v167_v17 = vmul.f32 %v216_v13, %v166_v12 }
  0x42   :  { %v148_v18 = vadd.f32 %v147_v16, %v144_v14  ;;  %v168_v19 = vadd.f32 %v167_v17, %v164_v15 }
  0x44   :  { %217 = vtanh.f32 %v148_v18 }
  0x45   :  { %219 = vtanh.f32 %v168_v19 }
  0x4e   :  { %v218_v20 = vpop.eup %217 }
  0x4f   :  { %v220_v21 = vpop.eup %219 }
  0x50   :  { %v171_v22 = vrot.slane %v220_v21, 7 }
  0x52   :  { %v174_v23 = vsel %vm173_vm0, %v218_v20, %v171_v22 }
  0x53   :  { %175 = vst [vmem:[%s313_s3] sm:$0x3] %v174_v23 }
  0x54   :  { %180 = vsyncpa [#allocation3], 1 }
  0x55   :  { %181 = vsyncpa [#allocation5], 1 }

</bundles_post_ra>
